<compile_context>
chip_gen: v7x
topology: tpu7x:2x2x1
jax: 0.10.0
libtpu: 0.0.40
codegen_flags: <defaults>
</compile_context>

<pallas_src>
from functools import partial
import math

import jax
import jax.numpy as jnp
from jax.experimental import pallas as pl
from jax.experimental.pallas import tpu as pltpu

_LANES = 128
_SUBLANES = 8
# Live VMEM per pallas_call ~= 4x stored tile (double-buffered in+out) plus
# ~5 full-tile f32 temporaries inside the body.
_LIVE_VMEM_BUDGET = 36 * 1024 * 1024
_VMEM_LIMIT = 48 * 1024 * 1024


def _round_up(x, m):
    return ((x + m - 1) // m) * m


def _row_tile(n_rows, row_elems, itemsize, target_steps=8):
    """Largest sublane-aligned row tile inside the live-VMEM budget, aiming for
    ~target_steps grid steps (so both v7x TensorCores get work and the pipeline
    has depth).  Tiny extents (< 8 rows) use the full extent."""
    if n_rows <= _SUBLANES:
        return n_rows
    per_row = row_elems * (4 * itemsize + 5 * 4)      # 4x stored + ~5x f32 temps
    cap = max(_SUBLANES, (_LIVE_VMEM_BUDGET // per_row) // _SUBLANES * _SUBLANES)
    want = max(_SUBLANES, _round_up(pl.cdiv(n_rows, target_steps), _SUBLANES))
    return min(cap, want)


def _lane_tile(s, col_elems, itemsize, target_steps=4):
    """Lane-aligned spatial tile for the channels_first fallback layout."""
    per_lane = col_elems * (4 * itemsize + 5 * 4)
    cap = max(_LANES, (_LIVE_VMEM_BUDGET // per_lane) // _LANES * _LANES)
    want = max(_LANES, _round_up(pl.cdiv(s, target_steps), _LANES))
    tn = min(cap, want)
    return s if s <= tn else tn                       # full (possibly unaligned) extent


# --------------------------------------------------------------------------
# Kernels
# --------------------------------------------------------------------------
def _ln_rows_kernel(x_ref, w_ref, b_ref, o_ref, *, eps):
    """Plain rows layout: (tm, C) tile, normalize each row over the lane axis."""
    x = x_ref[...].astype(jnp.float32)
    mean = jnp.mean(x, axis=-1, keepdims=True)
    xc = x - mean
    var = jnp.mean(xc * xc, axis=-1, keepdims=True)    # biased var (matches torch)
    inv = jax.lax.rsqrt(var + eps)
    o_ref[...] = (xc * inv * w_ref[...] + b_ref[...]).astype(o_ref.dtype)


def _ln_rows_grouped_kernel(x_ref, w_ref, b_ref, avg_ref, o_ref, *, eps):
    """Lane-dense layout for small C (C divides 128).

    Each (tm, 128) tile row packs G = 128 // C original rows.  Per-group mean
    and variance are produced (and re-broadcast to their lanes) by multiplying
    with the constant block-diagonal averaging matrix `avg_ref` on the MXU, so
    all vector work stays 128-lane dense and stores are unmasked.  `avg` is
    hoisted into the wrapper and arrives as a resident constant block.
    """
    x = x_ref[...].astype(jnp.float32)                 # (tm, 128)
    avg = avg_ref[...]                                 # (128, 128), constant
    mean = jnp.dot(x, avg, preferred_element_type=jnp.float32)       # group mean, bcast
    xc = x - mean
    var = jnp.dot(xc * xc, avg, preferred_element_type=jnp.float32)  # group var, bcast
    inv = jax.lax.rsqrt(var + eps)
    o_ref[...] = (xc * inv * w_ref[...] + b_ref[...]).astype(o_ref.dtype)


def _ln_cfirst_kernel(x_ref, w_ref, b_ref, o_ref, *, eps):
    """Channels-first: reduce over the channel axis (axis=1).

    Used for both block layouts:
      (1, C, tr, 128)  — spatial repacked onto (sublane, lane), C outer (dense)
      (1, C, tn)       — fallback when spatial is not a multiple of 128
    weight/bias arrive as resident (1, C, 1[, 1]) f32 blocks.
    """
    x = x_ref[...].astype(jnp.float32)
    mean = jnp.mean(x, axis=1, keepdims=True)
    xc = x - mean
    var = jnp.mean(xc * xc, axis=1, keepdims=True)
    inv = jax.lax.rsqrt(var + eps)
    o_ref[...] = (xc * inv * w_ref[...] + b_ref[...]).astype(o_ref.dtype)


# --------------------------------------------------------------------------
# Wrappers
# --------------------------------------------------------------------------
def _layernorm_channels_last(x2d, weight, bias, eps):
    n, c = x2d.shape
    w32 = weight.astype(jnp.float32)
    b32 = bias.astype(jnp.float32)
    itemsize = jnp.dtype(x2d.dtype).itemsize

    grouped = (c < _LANES) and (_LANES % c == 0)
    if grouped:
        g = _LANES // c
        n_pad = _round_up(n, g)
        xs = x2d if n_pad == n else jnp.pad(x2d, ((0, n_pad - n), (0, 0)))
        cw = _LANES
        nf = n_pad // g
        xk = xs.reshape(nf, cw)                         # free row-major fold
        wk = jnp.tile(w32, (g,)).reshape(1, cw)
        bk = jnp.tile(b32, (g,)).reshape(1, cw)
        # Constant block-diagonal averaging matrix (hoisted out of the kernel).
        grp = jnp.arange(_LANES, dtype=jnp.int32) // c
        avgm = (grp[:, None] == grp[None, :]).astype(jnp.float32) * (1.0 / c)
        kernel = partial(_ln_rows_grouped_kernel, eps=eps)
        extra_in = [avgm]
        extra_specs = [pl.BlockSpec((_LANES, _LANES), lambda i: (0, 0))]
    else:
        cw = c
        nf = n
        xk = x2d
        wk = w32.reshape(1, cw)
        bk = b32.reshape(1, cw)
        kernel = partial(_ln_rows_kernel, eps=eps)
        extra_in = []
        extra_specs = []

    tm = _row_tile(nf, cw, itemsize)
    grid = (pl.cdiv(nf, tm),)                           # ragged last block is masked

    yk = pl.pallas_call(
        kernel,
        out_shape=jax.ShapeDtypeStruct((nf, cw), x2d.dtype),
        grid_spec=pltpu.PrefetchScalarGridSpec(
            num_scalar_prefetch=0,
            grid=grid,
            in_specs=[
                pl.BlockSpec((tm, cw), lambda i: (i, 0)),
                pl.BlockSpec((1, cw), lambda i: (0, 0)),
                pl.BlockSpec((1, cw), lambda i: (0, 0)),
            ] + extra_specs,
            out_specs=pl.BlockSpec((tm, cw), lambda i: (i, 0)),
        ),
        compiler_params=pltpu.CompilerParams(
            dimension_semantics=("parallel",),
            vmem_limit_bytes=_VMEM_LIMIT,
        ),
    )(xk, wk, bk, *extra_in)

    if grouped:
        y = yk.reshape(-1, c)
        if y.shape[0] != n:
            y = y[:n]
        return y
    return yk


def _layernorm_channels_first(x, weight, bias, eps):
    b, c = x.shape[0], x.shape[1]
    s = math.prod(x.shape[2:]) if len(x.shape) > 2 else 1
    w32 = weight.astype(jnp.float32)
    b32 = bias.astype(jnp.float32)
    itemsize = jnp.dtype(x.dtype).itemsize

    if s % _LANES == 0:
        # Preferred layout: spatial repacked onto (sublane, lane); C is an
        # outer block dim, so every vector op runs at full lane density and the
        # channel reduce is a plain VPU add chain.  Free row-major reshape.
        nr = s // _LANES
        xk = x.reshape(b, c, nr, _LANES)
        wk = w32.reshape(1, c, 1, 1)
        bk = b32.reshape(1, c, 1, 1)
        tr = _row_tile(nr, c * _LANES, itemsize, target_steps=4)
        grid = (b, pl.cdiv(nr, tr))
        in_specs = [
            pl.BlockSpec((1, c, tr, _LANES), lambda i, j: (i, 0, j, 0)),
            pl.BlockSpec((1, c, 1, 1), lambda i, j: (0, 0, 0, 0)),
            pl.BlockSpec((1, c, 1, 1), lambda i, j: (0, 0, 0, 0)),
        ]
        out_spec = pl.BlockSpec((1, c, tr, _LANES), lambda i, j: (i, 0, j, 0))
        out_shape = jax.ShapeDtypeStruct((b, c, nr, _LANES), x.dtype)
    else:
        # Fallback (spatial not a multiple of 128): transpose-free (1, C, tn).
        xk = x.reshape(b, c, s)
        wk = w32.reshape(1, c, 1)
        bk = b32.reshape(1, c, 1)
        tn = _lane_tile(s, c, itemsize)
        grid = (b, pl.cdiv(s, tn))
        in_specs = [
            pl.BlockSpec((1, c, tn), lambda i, j: (i, 0, j)),
            pl.BlockSpec((1, c, 1), lambda i, j: (0, 0, 0)),
            pl.BlockSpec((1, c, 1), lambda i, j: (0, 0, 0)),
        ]
        out_spec = pl.BlockSpec((1, c, tn), lambda i, j: (i, 0, j))
        out_shape = jax.ShapeDtypeStruct((b, c, s), x.dtype)

    y = pl.pallas_call(
        partial(_ln_cfirst_kernel, eps=eps),
        out_shape=out_shape,
        grid_spec=pltpu.PrefetchScalarGridSpec(
            num_scalar_prefetch=0,
            grid=grid,
            in_specs=in_specs,
            out_specs=out_spec,
        ),
        compiler_params=pltpu.CompilerParams(
            dimension_semantics=("parallel", "parallel"),
            vmem_limit_bytes=_VMEM_LIMIT,
        ),
    )(xk, wk, bk)
    return y.reshape(x.shape)


def layer_norm(x, weight, bias, eps=1e-6, data_format="channels_last"):
    """Pallas LayerNorm matching the PyTorch module's two data formats."""
    if data_format == "channels_last":
        c = x.shape[-1]
        y2d = _layernorm_channels_last(x.reshape(-1, c), weight, bias, eps)
        return y2d.reshape(x.shape)
    elif data_format == "channels_first":
        return _layernorm_channels_first(x, weight, bias, eps)
    else:
        raise NotImplementedError


# --------------------------------------------------------------------------
# Pure-JAX reference mirroring the PyTorch forward
# --------------------------------------------------------------------------
def _layer_norm_ref(x, weight, bias, eps=1e-6, data_format="channels_last"):
    if data_format == "channels_last":
        u = jnp.mean(x, axis=-1, keepdims=True)
        s = jnp.mean((x - u) ** 2, axis=-1, keepdims=True)
        xn = (x - u) / jnp.sqrt(s + eps)
        return xn * weight + bias
    else:
        u = jnp.mean(x, axis=1, keepdims=True)
        s = jnp.mean((x - u) ** 2, axis=1, keepdims=True)
        xn = (x - u) / jnp.sqrt(s + eps)
        bshape = (1, -1) + (1,) * (x.ndim - 2)
        return weight.reshape(bshape) * xn + bias.reshape(bshape)


if __name__ == "__main__":
    key = jax.random.PRNGKey(0)
    k1, k2, k3, k4, k5, k6 = jax.random.split(key, 6)

    # ---- channels_last, C=32 (lane-dense grouped path, no padding needed) ----
    C = 32
    x = jax.random.normal(k1, (2, 8, 8, C), dtype=jnp.float32)
    w = 1.0 + 0.1 * jax.random.normal(k2, (C,), dtype=jnp.float32)
    b = 0.1 * jax.random.normal(k3, (C,), dtype=jnp.float32)
    y = jax.block_until_ready(layer_norm(x, w, b, 1e-6, "channels_last"))
    ref = _layer_norm_ref(x, w, b, 1e-6, "channels_last")
    assert jnp.allclose(y, ref, atol=1e-4, rtol=1e-4), "channels_last C=32 mismatch"

    # ---- channels_last, C=32 with row count NOT a multiple of g (pad path) ----
    xp = jax.random.normal(k4, (3, 7, 5, C), dtype=jnp.float32)
    yp = jax.block_until_ready(layer_norm(xp, w, b, 1e-6, "channels_last"))
    refp = _layer_norm_ref(xp, w, b, 1e-6, "channels_last")
    assert jnp.allclose(yp, refp, atol=1e-4, rtol=1e-4), "channels_last padded-N mismatch"

    # ---- channels_first 3D conv case: (B, C, D, H, W), C=4, spatial % 128 == 0 ----
    Cf = 4
    xf = jax.random.normal(k4, (2, Cf, 8, 8, 8), dtype=jnp.float32)
    wf = 1.0 + 0.1 * jax.random.normal(k5, (Cf,), dtype=jnp.float32)
    bf = 0.1 * jax.random.normal(k6, (Cf,), dtype=jnp.float32)
    yf = jax.block_until_ready(layer_norm(xf, wf, bf, 1e-6, "channels_first"))
    reff = _layer_norm_ref(xf, wf, bf, 1e-6, "channels_first")
    assert jnp.allclose(yf, reff, atol=1e-4, rtol=1e-4), "channels_first packed mismatch"

    # ---- channels_first with spatial NOT a multiple of 128 (fallback layout) ----
    xg = jax.random.normal(k1, (2, Cf, 5, 7, 3), dtype=jnp.float32)
    yg = jax.block_until_ready(layer_norm(xg, wf, bf, 1e-6, "channels_first"))
    refg = _layer_norm_ref(xg, wf, bf, 1e-6, "channels_first")
    assert jnp.allclose(yg, refg, atol=1e-4, rtol=1e-4), "channels_first fallback mismatch"

    # ---- channels_last fallback path (C=48 does not divide 128, ragged N) ----
    Cg = 48
    xh = jax.random.normal(k1, (3, 7, 5, Cg), dtype=jnp.float32)
    wh = 1.0 + 0.1 * jax.random.normal(k2, (Cg,), dtype=jnp.float32)
    bh = 0.1 * jax.random.normal(k3, (Cg,), dtype=jnp.float32)
    yh = jax.block_until_ready(layer_norm(xh, wh, bh, 1e-6, "channels_last"))
    refh = _layer_norm_ref(xh, wh, bh, 1e-6, "channels_last")
    assert jnp.allclose(yh, refh, atol=1e-4, rtol=1e-4), "channels_last C=48 mismatch"

    # ---- channels_last, multi-step grid with ragged (masked) last block ----
    x4 = jax.random.normal(k4, (4, 10, 100, C), dtype=jnp.float32)
    y4 = jax.block_until_ready(layer_norm(x4, w, b, 1e-6, "channels_last"))
    ref4 = _layer_norm_ref(x4, w, b, 1e-6, "channels_last")
    assert jnp.allclose(y4, ref4, atol=1e-4, rtol=1e-4), "channels_last multi-block mismatch"

    # ---- bf16 input (exercises stored-dtype tile budgeting) ----
    xb = x.astype(jnp.bfloat16)
    yb = jax.block_until_ready(layer_norm(xb, w, b, 1e-6, "channels_last"))
    refb = _layer_norm_ref(xb.astype(jnp.float32), w, b, 1e-6, "channels_last")
    assert jnp.allclose(yb.astype(jnp.float32), refb, atol=5e-2, rtol=5e-2), \
        "channels_last bf16 mismatch"

    print("KERNEL_OK")
</pallas_src>

<mosaic_0001>
module attributes {stable_mosaic.version = 11 : i64} {
  func.func @_ln_rows_grouped_kernel(%arg0: i32, %arg1: memref<8x128xf32, #tpu.memory_space<vmem>>, %arg2: memref<1x128xf32, #tpu.memory_space<vmem>>, %arg3: memref<1x128xf32, #tpu.memory_space<vmem>>, %arg4: memref<128x128xf32, #tpu.memory_space<vmem>>, %arg5: memref<8x128xf32, #tpu.memory_space<vmem>>) attributes {dimension_semantics = [#tpu.dimension_semantics<parallel>], iteration_bounds = array<i64: 4>, scalar_prefetch = 0 : i64, scratch_operands = 0 : i64, tpu.core_type = #tpu.core_type<tc>, window_params = [{transform_indices = @transform_0, window_bounds = array<i64: 8, 128>}, {pipeline_mode = #tpu.pipeline_mode<synchronous>, transform_indices = @transform_1, window_bounds = array<i64: 1, 128>}, {pipeline_mode = #tpu.pipeline_mode<synchronous>, transform_indices = @transform_2, window_bounds = array<i64: 1, 128>}, {pipeline_mode = #tpu.pipeline_mode<synchronous>, transform_indices = @transform_3, window_bounds = array<i64: 128, 128>}, {transform_indices = @transform_4, window_bounds = array<i64: 8, 128>}]} {
    %c0 = arith.constant 0 : index
    %c0_0 = arith.constant 0 : index
    %0 = vector.load %arg1[%c0, %c0_0] : memref<8x128xf32, #tpu.memory_space<vmem>>, vector<8x128xf32>
    %c0_1 = arith.constant 0 : index
    %c0_2 = arith.constant 0 : index
    %1 = vector.load %arg4[%c0_1, %c0_2] : memref<128x128xf32, #tpu.memory_space<vmem>>, vector<128x128xf32>
    %cst = arith.constant dense<0.000000e+00> : vector<8x128xf32>
    %2 = tpu.matmul %0, %1, %cst {dimension_numbers = #tpu.dot_dimension_numbers<[1], [0], [0], [1], [0, 0, 1, 1], [], []>} : vector<8x128xf32>, vector<128x128xf32>, vector<8x128xf32> -> vector<8x128xf32>
    %3 = arith.subf %0, %2 : vector<8x128xf32>
    %4 = arith.mulf %3, %3 : vector<8x128xf32>
    %cst_3 = arith.constant dense<0.000000e+00> : vector<8x128xf32>
    %5 = tpu.matmul %4, %1, %cst_3 {dimension_numbers = #tpu.dot_dimension_numbers<[1], [0], [0], [1], [0, 0, 1, 1], [], []>} : vector<8x128xf32>, vector<128x128xf32>, vector<8x128xf32> -> vector<8x128xf32>
    %cst_4 = arith.constant 9.99999997E-7 : f32
    %6 = vector.broadcast %cst_4 : f32 to vector<8x128xf32>
    %7 = arith.addf %5, %6 : vector<8x128xf32>
    %8 = math.rsqrt %7 : vector<8x128xf32>
    %9 = arith.mulf %3, %8 : vector<8x128xf32>
    %c0_5 = arith.constant 0 : index
    %c0_6 = arith.constant 0 : index
    %10 = vector.load %arg2[%c0_5, %c0_6] : memref<1x128xf32, #tpu.memory_space<vmem>>, vector<1x128xf32>
    %11 = vector.broadcast %10 : vector<1x128xf32> to vector<8x128xf32>
    %12 = arith.mulf %9, %11 : vector<8x128xf32>
    %c0_7 = arith.constant 0 : index
    %c0_8 = arith.constant 0 : index
    %13 = vector.load %arg3[%c0_7, %c0_8] : memref<1x128xf32, #tpu.memory_space<vmem>>, vector<1x128xf32>
    %14 = vector.broadcast %13 : vector<1x128xf32> to vector<8x128xf32>
    %15 = arith.addf %12, %14 : vector<8x128xf32>
    %c0_9 = arith.constant 0 : index
    %c0_10 = arith.constant 0 : index
    %16 = vector.load %arg5[%c0_9, %c0_10] : memref<8x128xf32, #tpu.memory_space<vmem>>, vector<8x128xf32>
    tpu.vector_store %arg5[%c0_9, %c0_10], %15 {strides = array<i32>} : memref<8x128xf32, #tpu.memory_space<vmem>>, vector<8x128xf32>,
    return
  }
  func.func @transform_0(%arg0: i32) -> (i32, i32) {
    %c0_i32 = arith.constant 0 : i32
    %c0_i32_0 = arith.constant 0 : i32
    return %arg0, %c0_i32 : i32, i32
  }
  func.func @transform_1(%arg0: i32) -> (i32, i32) {
    %c0_i32 = arith.constant 0 : i32
    %c0_i32_0 = arith.constant 0 : i32
    %c0_i32_1 = arith.constant 0 : i32
    return %c0_i32, %c0_i32_0 : i32, i32
  }
  func.func @transform_2(%arg0: i32) -> (i32, i32) {
    %c0_i32 = arith.constant 0 : i32
    %c0_i32_0 = arith.constant 0 : i32
    %c0_i32_1 = arith.constant 0 : i32
    return %c0_i32, %c0_i32_0 : i32, i32
  }
  func.func @transform_3(%arg0: i32) -> (i32, i32) {
    %c0_i32 = arith.constant 0 : i32
    %c0_i32_0 = arith.constant 0 : i32
    %c0_i32_1 = arith.constant 0 : i32
    return %c0_i32, %c0_i32_0 : i32, i32
  }
  func.func @transform_4(%arg0: i32) -> (i32, i32) {
    %c0_i32 = arith.constant 0 : i32
    %c0_i32_0 = arith.constant 0 : i32
    return %arg0, %c0_i32 : i32, i32
  }
}

</mosaic_0001>

<bundles_post_ra>
// kernel: tpu_custom_call.1
= control target key start
LH: loop header
LB: loop body
LE: loop exit
PB: predicated region body
PF: predicated region fallthrough
CT: control target
= control target key end

     0   :  { %9 = vsyncpa [#allocation3], 0  ;;  %s1095_s0 = inlined_call_operand.hbm [shape: f32[32,128], index: 0, kind: input, shape index: {}]   ;;  %s1096_s1 = inlined_call_operand.vmem [shape: f32[1,128], index: 1, kind: input, shape index: {}]   ;;  %s1097_s2 = inlined_call_operand.vmem [shape: f32[1,128], index: 2, kind: input, shape index: {}]   ;;  %s1098_s3 = inlined_call_operand.hbm [shape: f32[128,128], index: 3, kind: input, shape index: {}]   ;;  %s1099_s4 = inlined_call_operand.hbm [shape: f32[32,128], index: 4, kind: output, shape index: {}]  }
   0x1   :  { %11 = vsyncpa [#allocation3 + $0x1], 0 }
   0x2   :  { %12 = vsyncpa [#allocation6], 0 }
   0x3   :  { %13 = vsyncpa [#allocation4], 0 }
   0x4   :  { %15 = vsyncpa [#allocation4 + $0x1], 0  ;;  %s895_s15 = smov 0   ;;  %s897_s16 = smov 0  }
   0x5   :  { %s899_s17 = smov 0   ;;  %s901_s18 = smov 0  }
   0x6 LB: > { %s916_s19 = sadd.s32 4294967295, %s860_s18   ;;  %s500_s20 = sadd.s32 4294967294, %s860_s18   ;;  %s860_s18 = sphi %s901_s18, %s1118_s18   ;;  %s856_s17 = sphi %s899_s17, %s1117_s17   ;;  %s852_s16 = sphi %s897_s16, %s1116_s16   ;;  %s848_s15 = sphi %s895_s15, %s1115_s15  }
   0x7   : > { %p41_p0 = scmp.ne.s32.totalorder %s852_s16, %s848_s15  ;;  %p1100_p1 = scmp.eq.s32.totalorder %s916_s19, 0 }
   0x8   : > { %p134_p3 = scmp.eq.s32.totalorder %s500_s20, 3  ;;  %p501_p5 = scmp.ge.s32.totalorder %s860_s18, 1 }
   0x9   : > { %p925_p4 = por %p1100_p1, %p41_p0  ;;  %p141_p7 = scmp.lt.s32.totalorder %s860_s18, 5 }
   0xa   : > { %p930_p6 = por %p134_p3, %p41_p0  ;;  %s862_s24 = smov [#allocation5]  }
   0xb   : > { %s1103_s21 = scalar_select %p925_p4, 1, 0 }
   0xc   : > { %s1104_s22 = scalar_select %p930_p6, 1, 0 }
   0xd   : > { %p935_p8 = pnand %p501_p5, %p141_p7  ;;  %s159_s25 = sshll.u32 %s862_s24, 4  ;;  %s160_s25 = int_to_ptr.vmem [resolvable:$true] %s159_s25 }
   0xe   : > { %s948_s27 = sadd.s32 1, %s860_s18   ;;  %s28_s28 = sadd.s32 1, %s856_s17 }
   0xf   : > { %s1105_s23 = scalar_select %p935_p8, 1, 0 }
  0x10   : > { %p676_p9 = pneg %p935_p8  ;;  %s25_s29 = ssub.s32 %s860_s18, %s948_s27 }
  0x11   : > { %s732_s6 = scalar_lea.hbm %s1098_s3, 2048 }
  0x12   : > { %p943_p10 = pnand %p676_p9, %p1100_p1  ;;  %p733_p11 = scmp.ne.s32.totalorder %s1098_s3, %s732_s6 }
  0x13   : > { %p739_p3 = scmp.lt.u32.totalorder %s732_s6, %s1098_s3 }
  0x14   : > { %p734_p12 = pneg %p943_p10 }
  0x16   : > { %p735_p13 = pnand %p734_p12, %p733_p11 }
  0x18   : > { %p736_p0 = pneg %p735_p13 }
  0x1a   : > { %p741_p5 = pnand %p739_p3, %p736_p0 }
  0x1c   : > { %744 = shalt.err (!%p741_p5)
}
  0x1d   : > { %s745_s11 = scalar_lea.vmem %s160_s25, 2048  ;;  %p753_p2 = scmp.lt.s32.totalorder %s160_s25, %s160_s25 }
  0x1e   : > { %p746_p7 = scmp.ne.s32.totalorder %s160_s25, %s745_s11  ;;  %p754_p6 = scmp.lt.s32.totalorder %s745_s11, %s745_s11 }
  0x20   : > { %p748_p9 = pnand %p746_p7, %p734_p12  ;;  %p755_p4 = por %p754_p6, %p753_p2 }
  0x22   : > { %p749_p1 = pneg %p748_p9 }
  0x24   : > { %p756_p8 = pnand %p755_p4, %p749_p1 }
  0x26   : > { %759 = shalt.err (!%p756_p8)
}
  0x27   : > { %s863_s12 = smov 128   ;;  %s864_s13 = smov 8  }
  0x28   : > { %679 = dma.hbm_to_vmem [thread:$0]  (!%p943_p10), %s1098_s3, 2048, %s160_s25, [#allocation6], %s863_s12, %s863_s12, %s864_s13  }
  0x29   : > { %p26_p11 = scmp.eq.s32.totalorder %s25_s29, 0  ;;  %p35_p2 = scmp.ne.s32.totalorder %s856_s17, %s852_s16 }
  0x2a   : > { %p36_p1 = scmp.eq.s32.totalorder %s860_s18, 0  ;;  %p689_p4 = scmp.lt.s32.totalorder %s860_s18, 4 }
  0x2b   : > { %s974_s24 = scalar_select %p26_p11, %s856_s17, %s28_s28  }
  0x2c   : > { %p37_p6 = por %p36_p1, %p35_p2  ;;  %p1107_p8 = scmp.eq.s32.totalorder %s916_s19, 3 }
  0x2d   : > { %s173_s5 = sand.u32 1, %s856_s17   ;;  %s505_s6 = sshll.u32 %s860_s18, 7 }
  0x2e   : > { %p978_p12 = por %p1107_p8, %p35_p2  ;;  %s504_s7 = sshll.u32 %s173_s5, 3 }
  0x2f   : > { %s987_s9 = scalar_lea.hbm %s1095_s0, %s505_s6  ;;  %s177_s25 = scalar_lea.vmem [#allocation2], %s504_s7 }
  0x30   : > { %s184_s28 = sshll.u32 %s177_s25, 4  ;;  %p989_p10 = pnand %p689_p4, %p37_p6  ;;  %s993_s28 = int_to_ptr.vmem [resolvable:$true] %s184_s28 }
  0x31   : > { %s174_s10 = scalar_lea.sflag [#allocation3], %s173_s5  ;;  %s760_s11 = scalar_lea.hbm %s987_s9, 128 }
  0x32   : > { %p761_p13 = scmp.ne.s32.totalorder %s987_s9, %s760_s11  ;;  %p762_p0 = pneg %p989_p10 }
  0x33   : > { %s765_s14 = scalar_lea.hbm %s1095_s0, 512  ;;  %p766_p7 = scmp.lt.u32.totalorder %s987_s9, %s1095_s0 }
  0x34   : > { %p763_p3 = pnand %p762_p0, %p761_p13  ;;  %p767_p9 = scmp.lt.u32.totalorder %s765_s14, %s760_s11 }
  0x35   : > { %p769_p2 = scmp.lt.u32.totalorder %s760_s11, %s987_s9 }
  0x36   : > { %p764_p5 = pneg %p763_p3  ;;  %p768_p11 = por %p767_p9, %p766_p7 }
  0x38   : > { %p770_p1 = por %p769_p2, %p768_p11 }
  0x3a   : > { %p771_p4 = pnand %p770_p1, %p764_p5 }
  0x3c   : > { %774 = shalt.err (!%p771_p4)
}
  0x3d   : > { %s775_s5 = scalar_lea.vmem %s993_s28, 128  ;;  %s865_s7 = smov [#allocation2]  }
  0x3e   : > { %p776_p6 = scmp.ne.s32.totalorder %s993_s28, %s775_s5  ;;  %s780_s26 = sshll.u32 %s865_s7, 4  ;;  %s781_s26 = int_to_ptr.vmem [resolvable:$false] %s780_s26 }
  0x3f   : > { %s782_s8 = scalar_lea.vmem %s781_s26, 256  ;;  %p783_p3 = scmp.lt.s32.totalorder %s993_s28, %s781_s26 }
  0x40   : > { %p778_p8 = pnand %p776_p6, %p762_p0  ;;  %p784_p7 = scmp.lt.s32.totalorder %s782_s8, %s775_s5 }
  0x42   : > { %p779_p13 = pneg %p778_p8  ;;  %p785_p9 = por %p784_p7, %p783_p3 }
  0x44   : > { %p786_p11 = pnand %p785_p9, %p779_p13 }
  0x46   : > { %789 = shalt.err (!%p786_p11)
}
  0x47   : > { %683 = dma.hbm_to_vmem [thread:$0]  (!%p989_p10), %s987_s9, 128, %s993_s28, %s174_s10  }
  0x48   : > { %p1110_p5 = scmp.ne.s32.totalorder %s1105_s23, 0 }
  0x49   : > { %s1023_s25 = sand.u32 (!%p1110_p5), 1, %s852_s16   ;;  %p1111_p0 = scmp.ne.s32.totalorder (!%p1110_p5), %s1103_s21, 0 }
  0x4a   : > { %193 = sbr.rel (%p1110_p5) target bundleno = 580 (0x244), region = 36  ;;  %s507_s11 = sshll.u32 (!%p1110_p5), %s1023_s25, 3 }
  0x4b   : > { %s196_s12 = scalar_lea.sflag (!%p1110_p5), [#allocation3], %s1023_s25  ;;  %s1029_s13 = scalar_lea.vmem (!%p1110_p5), [#allocation2], %s507_s11 }
  0x51   : > { %835 = dma.done.wait (%p1111_p0), %s196_s12, 128  }
  0x52   : > { %837 = vsyncadd (%p1111_p0), %s196_s12, 4294967168  ;;  %p1112_p10 = scmp.eq.s32.totalorder %s916_s19, 0 }
  0x54   : > { %839 = dma.done.wait (%p1112_p10), [#allocation6], 2048   ;;  %p1113_p2 = pmov %p1112_p10 }
  0x55   : > { %v866_v0 = vmov 0.0|0.0   ;;  %vm867_vm0 = vmmov 0   ;;  %v868_v1 = vmov 0.0   ;;  %v229_v2 = vld [vmem:[#allocation5] sm:$0xff]  ;;  %v230_v3 = vld [vmem:[#allocation5 + $0x8] sm:$0xff]  ;;  %v231_v4 = vld [vmem:[#allocation5 + $0x10] sm:$0xff] }
  0x56   : > { %841 = vsyncadd (%p1113_p2), [#allocation6], 4294965248  ;;  %620 = vmatprep.subr.bf16.mxu0 %v866_v0  ;;  %582 = vmatprep.mubr.msk.f32.mxu0 %vm867_vm0, %v868_v1  ;;  %v621_v5 = vpack.c.bf16 %v230_v3, %v229_v2  ;;  %v232_v6 = vld [vmem:[#allocation5 + $0x18] sm:$0xff]  ;;  %v233_v8 = vld [vmem:[#allocation5 + $0x20] sm:$0xff]  ;;  %s513_s29 = sshll.u32 %s916_s19, 7  ;;  %s227_s10 = scalar_lea.vmem [#allocation7], %s507_s11 }
  0x57   : > { %644 = vmatprep.subr.bf16.mxu1 %v866_v0  ;;  %617 = vmatprep.mubr.msk.f32.mxu1 %vm867_vm0, %v868_v1  ;;  %v624_v7 = vpack.c.bf16 %v232_v6, %v231_v4  ;;  %v234_v9 = vld [vmem:[#allocation5 + $0x28] sm:$0xff]  ;;  %v235_v11 = vld [vmem:[#allocation5 + $0x30] sm:$0xff]  ;;  %v236_v12 = vld [vmem:[#allocation5 + $0x38] sm:$0xff]  ;;  %s420_s14 = sshll.u32 %s227_s10, 4  ;;  %s1052_s5 = scalar_lea.hbm %s1099_s4, %s513_s29  ;;  %s1054_s14 = int_to_ptr.vmem [resolvable:$true] %s420_s14 }
  0x58   : > { %622 = vmatpush3.bf16.msra.mxu0 %v621_v5  ;;  %646 = vmatpush3.bf16.msra.mxu1 %v621_v5  ;;  %v627_v10 = vpack.c.bf16 %v234_v9, %v233_v8  ;;  %v630_v13 = vpack.c.bf16 %v236_v12, %v235_v11  ;;  %v237_v14 = vld [vmem:[#allocation5 + $0x40] sm:$0xff]  ;;  %v238_v15 = vld [vmem:[#allocation5 + $0x48] sm:$0xff]  ;;  %v239_v17 = vld [vmem:[#allocation5 + $0x50] sm:$0xff]  ;;  %s407_s7 = scalar_lea.sflag [#allocation4], %s1023_s25  ;;  %s790_s26 = scalar_lea.vmem %s1054_s14, 128 }
  0x59   : > { %623 = vmatprep.subr.bf16.mxu0 %v866_v0  ;;  %647 = vmatprep.subr.bf16.mxu1 %v866_v0  ;;  %v633_v16 = vpack.c.bf16 %v238_v15, %v237_v14  ;;  %v240_v18 = vld [vmem:[#allocation5 + $0x58] sm:$0xff]  ;;  %v241_v20 = vld [vmem:[#allocation5 + $0x60] sm:$0xff]  ;;  %v242_v21 = vld [vmem:[#allocation5 + $0x68] sm:$0xff]  ;;  %p791_p1 = scmp.ne.s32.totalorder %s1054_s14, %s790_s26  ;;  %s869_s19 = smov [#allocation7]  }
  0x5a   : > { %v636_v19 = vpack.c.bf16 %v240_v18, %v239_v17  ;;  %v639_v22 = vpack.c.bf16 %v242_v21, %v241_v20  ;;  %v243_v23 = vld [vmem:[#allocation5 + $0x70] sm:$0xff]  ;;  %v244_v24 = vld [vmem:[#allocation5 + $0x78] sm:$0xff]  ;;  %s794_s8 = sshll.u32 %s869_s19, 4  ;;  %s795_s8 = int_to_ptr.vmem [resolvable:$false] %s794_s8 }
  0x5b   : > { %v642_v25 = vpack.c.bf16 %v244_v24, %v243_v23  ;;  %v228_v26 = vld [vmem:[%s1029_s13] sm:$0xff]  ;;  %p792_p4 = pnand %p791_p1, %p978_p12  ;;  %s796_s11 = scalar_lea.vmem %s795_s8, 256 }
  0x5c   : > { %625 = vmatpush3.bf16.msra.mxu0 %v624_v7  ;;  %649 = vmatpush3.bf16.msra.mxu1 %v624_v7  ;;  %v510_v35 = vld [vmem:[%s1096_s1] ss:$0 sm:$0xff]  ;;  %p797_p8 = scmp.lt.s32.totalorder %s1054_s14, %s795_s8  ;;  %p798_p13 = scmp.lt.s32.totalorder %s796_s11, %s790_s26 }
  0x5d   : > { %626 = vmatprep.subr.bf16.mxu0 %v866_v0  ;;  %650 = vmatprep.subr.bf16.mxu1 %v866_v0  ;;  %v511_v37 = vld [vmem:[%s1097_s2] ss:$0 sm:$0xff]  ;;  %p793_p6 = pneg %p792_p4 }
  0x5e   : > { %p799_p3 = por %p798_p13, %p797_p8 }
  0x60   : > { %628 = vmatpush3.bf16.msra.mxu0 %v627_v10  ;;  %652 = vmatpush3.bf16.msra.mxu1 %v627_v10  ;;  %p800_p7 = pnand %p799_p3, %p793_p6 }
  0x61   : > { %629 = vmatprep.subr.bf16.mxu0 %v866_v0  ;;  %653 = vmatprep.subr.bf16.mxu1 %v866_v0 }
  0x64   : > { %631 = vmatpush3.bf16.msra.mxu0 %v630_v13  ;;  %655 = vmatpush3.bf16.msra.mxu1 %v630_v13 }
  0x65   : > { %632 = vmatprep.subr.bf16.mxu0 %v866_v0  ;;  %656 = vmatprep.subr.bf16.mxu1 %v866_v0 }
  0x68   : > { %634 = vmatpush3.bf16.msra.mxu0 %v633_v16  ;;  %658 = vmatpush3.bf16.msra.mxu1 %v633_v16 }
  0x69   : > { %635 = vmatprep.subr.bf16.mxu0 %v866_v0  ;;  %659 = vmatprep.subr.bf16.mxu1 %v866_v0 }
  0x6c   : > { %637 = vmatpush3.bf16.msra.mxu0 %v636_v19  ;;  %661 = vmatpush3.bf16.msra.mxu1 %v636_v19 }
  0x6d   : > { %638 = vmatprep.subr.bf16.mxu0 %v866_v0  ;;  %662 = vmatprep.subr.bf16.mxu1 %v866_v0 }
  0x70   : > { %640 = vmatpush3.bf16.msra.mxu0 %v639_v22  ;;  %664 = vmatpush3.bf16.msra.mxu1 %v639_v22 }
  0x71   : > { %641 = vmatprep.subr.bf16.mxu0 %v866_v0  ;;  %665 = vmatprep.subr.bf16.mxu1 %v866_v0 }
  0x74   : > { %643 = vmatpush3.bf16.msra.mxu0 %v642_v25  ;;  %667 = vmatpush3.bf16.msra.mxu1 %v642_v25 }
  0x77   : > { %583 = vmatmul.mubr.f32.vlgmr.msra.gmra.mrb[0].mxu0 %v228_v26 }
 0x14a   : > { %v311_v27 = vpop.f32.mrb[0].mxu0 }
 0x14b   : > { %v315_v28 = vsub.f32 %v228_v26, %v311_v27  ;;  %v584_v29 = vpop.f32.mrb[1].mxu0 }
 0x14d   : > { %v316_v30 = vmul.f32 %v315_v28, %v315_v28 }
 0x14f   : > { %618 = vmatmul.mubr.f32.vlgmr.msra.gmra.mrb[0].mxu1 %v316_v30 }
 0x222   : > { %v383_v31 = vpop.f32.mrb[0].mxu1 }
 0x223   : > { %v384_v32 = vadd.f32 1e-06, %v383_v31  ;;  %v619_v33 = vpop.f32.mrb[1].mxu1 }
 0x225   : > { %730 = vrsqrt.f32 %v384_v32 }
 0x22f   : > { %v731_v34 = vpop.eup %730 }
 0x230   : > { %v388_v36 = vmul.f32 %v731_v34, %v315_v28 }
 0x232   : > { %v396_v38 = vmul.f32 %v510_v35, %v388_v36 }
 0x234   : > { %v404_v39 = vadd.f32 %v511_v37, %v396_v38 }
 0x236   : > { %405 = vst [vmem:[%s227_s10] sm:$0xff] %v404_v39 }
 0x237   : > { %803 = shalt.err (!%p800_p7)
}
 0x238   : > { %s804_s25 = scalar_lea.hbm %s1052_s5, 128  ;;  %s808_s21 = scalar_lea.hbm %s1099_s4, 512 }
 0x239   : > { %p805_p9 = scmp.ne.s32.totalorder %s1052_s5, %s804_s25  ;;  %p809_p0 = scmp.lt.u32.totalorder %s1052_s5, %s1099_s4 }
 0x23a   : > { %p810_p10 = scmp.lt.u32.totalorder %s808_s21, %s804_s25  ;;  %p812_p1 = scmp.lt.u32.totalorder %s804_s25, %s1052_s5 }
 0x23b   : > { %p806_p11 = pnand %p805_p9, %p978_p12 }
 0x23c   : > { %p811_p2 = por %p810_p10, %p809_p0 }
 0x23d   : > { %p807_p5 = pneg %p806_p11 }
 0x23e   : > { %p813_p4 = por %p812_p1, %p811_p2 }
 0x240   : > { %p814_p6 = pnand %p813_p4, %p807_p5 }
 0x242   : > { %817 = shalt.err (!%p814_p6)
}
 0x243   : > { %674 = dma.vmem_to_hbm [thread:$0]  (%p978_p12), %s1054_s14, 128, %s1052_s5, %s407_s7  }
 0x244 PF: > { %p691_p8 = scmp.ge.s32.totalorder %s860_s18, 2  ;;  %s432_s28 = sand.u32 1, %s848_s15  }
 0x245   : > { %p1114_p13 = scmp.ne.s32.totalorder %s1104_s22, 0  ;;  %s433_s29 = scalar_lea.sflag [#allocation4], %s432_s28 }
 0x247   : > { %p685_p3 = pnand %p691_p8, %p1114_p13 }
 0x249   : > { %843 = dma.done.wait (!%p685_p3), %s433_s29, 128  }
 0x24a   : > { %845 = vsyncadd (!%p685_p3), %s433_s29, 4294967168  ;;  %p18_p7 = scmp.ge.s32.totalorder %s948_s27, 6   ;;  %s1115_s15 = smov %s852_s16 }
 0x24b   : > { %s1116_s16 = smov %s856_s17  ;;  %s1117_s17 = smov %s974_s24 }
 0x24c   : > { %s1118_s18 = smov %s948_s27  ;;  %20 = sbr.rel (!%p18_p7) target bundleno = 6 (0x6), region = 85 }
 0x253   :  { %438 = vsyncpa [#allocation3], 1 }
 0x254   :  { %440 = vsyncpa [#allocation3 + $0x1], 1 }
 0x255   :  { %441 = vsyncpa [#allocation6], 1 }
 0x256   :  { %442 = vsyncpa [#allocation4], 1 }
 0x257   :  { %444 = vsyncpa [#allocation4 + $0x1], 1 }

</bundles_post_ra>
